<compile_context>
chip_gen: v7x
topology: tpu7x:2x2x1
jax: 0.10.0
libtpu: 0.0.40
codegen_flags: <defaults>
</compile_context>

<pallas_src>
import jax
import jax.numpy as jnp
import numpy as np
from jax.experimental import pallas as pl
from jax.experimental.pallas import tpu as pltpu


# ----------------------------------------------------------------------------
# Parameter packing: all Linear weights/biases (PyTorch [out, in] / [out]
# layout) -> one f32 [R, C] blob with static column offsets.
# ----------------------------------------------------------------------------
def pack_params(params):
    n_layers = len(params)
    assert n_layers >= 2, "F_cons always has at least 2 Linear layers"
    pieces, meta = [], []
    col = 0
    for li, (w, b) in enumerate(params):
        w = jnp.asarray(w, jnp.float32)
        b = jnp.asarray(b, jnp.float32)
        out_dim, in_dim = w.shape
        if li == 0:                       # Linear(1, H0): keep as [H0, 1] column
            wcols = w
        elif li == n_layers - 1:          # Linear(H, 1): store transposed [H, 1]
            wcols = w.T
        else:                             # hidden->hidden: [Hout, Hin]
            wcols = w
        bcol = b.reshape(out_dim, 1)
        meta.append(dict(in_dim=int(in_dim), out_dim=int(out_dim),
                         w_col=col, b_col=col + int(wcols.shape[1])))
        pieces.append(wcols)
        pieces.append(bcol)
        col += int(wcols.shape[1]) + 1
    R = max(int(p.shape[0]) for p in pieces)
    padded = [jnp.pad(p, ((0, R - p.shape[0]), (0, 0))) for p in pieces]
    blob = jnp.concatenate(padded, axis=1)
    return blob, meta, R


# ----------------------------------------------------------------------------
# Kernel builder (n_layers / offsets are static Python values).
# ----------------------------------------------------------------------------
def make_afm_kernel(meta, *, Q, k):
    inv_Q = 1.0 / Q
    inv_k = 1.0 / k
    m0, ml = meta[0], meta[-1]

    def kernel(x_ref, d_ref, wb_ref, drive_ref, out_ref):
        # Transposed layout: [feature, batch_tile]; batch on the 128-lane axis.
        y = x_ref[0:1, :]                                            # [1, Bt]
        z = x_ref[1:2, :]                                            # [1, Bt]

        # ---- F_cons MLP -----------------------------------------------------
        # Layer 0: Linear(1, H0) as a VPU broadcast (avoids a K=1 MXU matmul).
        w0 = wb_ref[0:m0["out_dim"], m0["w_col"]:m0["w_col"] + 1]    # [H0, 1]
        b0 = wb_ref[0:m0["out_dim"], m0["b_col"]:m0["b_col"] + 1]    # [H0, 1]
        h = w0 * z + b0                                              # [H0, Bt]

        # Hidden->hidden layers (if any): lane-dense MXU matmul.
        for m in meta[1:-1]:
            W = wb_ref[0:m["out_dim"], m["w_col"]:m["w_col"] + m["in_dim"]]
            b = wb_ref[0:m["out_dim"], m["b_col"]:m["b_col"] + 1]
            h = jnp.dot(W, jnp.tanh(h),
                        preferred_element_type=jnp.float32) + b      # [Hi, Bt]

        # Last layer: Linear(H, 1) as VPU multiply + XLU sublane reduce
        # (avoids an N=1 MXU matmul).
        wl = wb_ref[0:ml["in_dim"], ml["w_col"]:ml["w_col"] + 1]     # [H, 1]
        bl = wb_ref[0:1, ml["b_col"]:ml["b_col"] + 1]                # [1, 1]
        F = jnp.sum(wl * jnp.tanh(h), axis=0, keepdims=True) + bl    # [1, Bt]

        # ---- ODE right-hand side --------------------------------------------
        drive_t = drive_ref[0]                        # (A0/Q) * cos(Om * t)
        drive = d_ref[...] + drive_t + F * inv_k                     # [1, Bt]
        out_ref[0:1, :] = (-inv_Q) * y - z + drive                   # dy/dt
        out_ref[1:2, :] = y                                          # dz/dt

    return kernel


# ----------------------------------------------------------------------------
# Wrapper.
# ----------------------------------------------------------------------------
def afm_neural_ode_forward(t, x, d, params, *, A0, Om, Q, k, block_b=None):
    """x: [B, 2] (x = [y, z]), d: [B, 1], params: list of (W[out,in], b[out])."""
    x = jnp.asarray(x, jnp.float32)
    d = jnp.asarray(d, jnp.float32)
    B = x.shape[0]

    # Pick a lane-dense batch tile: big enough to amortize grid-step overhead,
    # small enough that multiple tiles exist for large B (megacore sharding).
    if block_b is None:
        block_b = min(4096, 128 * pl.cdiv(B, 128))
    assert block_b % 128 == 0, "batch tile must be a multiple of the lane width"
    n_tiles = pl.cdiv(B, block_b)
    B_pad = n_tiles * block_b

    # Lane-dense transposed layout, batch padded to the tile size.
    xT = jnp.pad(x.T, ((0, 0), (0, B_pad - B)))                      # [2, Bp]
    dT = jnp.pad(d.T, ((0, 0), (0, B_pad - B)))                      # [1, Bp]

    # One static weight blob (VMEM-resident across grid steps).
    blob, meta, R = pack_params(params)
    C = blob.shape[1]

    # Per-call scalar drive term goes through SMEM (keeps the blob constant).
    drive_t = ((A0 / Q) * jnp.cos(jnp.asarray(Om * t, dtype=jnp.float32))
               ).reshape((1,)).astype(jnp.float32)

    kernel = make_afm_kernel(meta, Q=float(Q), k=float(k))

    outT = pl.pallas_call(
        kernel,
        out_shape=jax.ShapeDtypeStruct((2, B_pad), jnp.float32),
        grid=(n_tiles,),
        in_specs=[
            pl.BlockSpec((2, block_b), lambda i: (0, i)),     # state tile
            pl.BlockSpec((1, block_b), lambda i: (0, i)),     # mean distance d
            pl.BlockSpec((R, C), lambda i: (0, 0)),           # weights: resident
            pl.BlockSpec(memory_space=pltpu.MemorySpace.SMEM),  # drive scalar
        ],
        out_specs=pl.BlockSpec((2, block_b), lambda i: (0, i)),
        compiler_params=pltpu.CompilerParams(
            dimension_semantics=("parallel",),        # uses both TCs on v7x
            vmem_limit_bytes=32 * 1024 * 1024,        # explicit guard (<= v7x)
        ),
    )(xT, dT, blob, drive_t)

    return outT[:, :B].T                                             # [B, 2]


# ----------------------------------------------------------------------------
# Pure-JAX reference (PyTorch module semantics) and parameter init.
# ----------------------------------------------------------------------------
def reference_forward(t, x, d, params, *, A0, Om, Q, k):
    y = x[:, 0:1]
    z = x[:, 1:2]
    h = z
    for li, (w, b) in enumerate(params):
        if li > 0:
            h = jnp.tanh(h)
        h = h @ w.T + b[None, :]
    F = h
    drive = d + (A0 / Q) * jnp.cos(jnp.asarray(Om * t, dtype=jnp.float32)) + F / k
    dy = (-1.0 / Q) * y - z + drive
    return jnp.concatenate([dy, y], axis=-1)


def init_params(key, hidden_nodes, std=1e-4, random_bias=False):
    """PyTorch-layout params. The real F_cons uses std=1e-4 and zero biases;
    the demo uses larger/random values so the correctness check exercises the
    tanh/MLP path non-trivially."""
    dims = [1] + list(hidden_nodes) + [1]
    params = []
    for i in range(len(dims) - 1):
        key, kw, kb = jax.random.split(key, 3)
        w = std * jax.random.normal(kw, (dims[i + 1], dims[i]), dtype=jnp.float32)
        if random_bias:
            b = 0.1 * jax.random.normal(kb, (dims[i + 1],), dtype=jnp.float32)
        else:
            b = jnp.zeros((dims[i + 1],), dtype=jnp.float32)
        params.append((w, b))
    return params


if __name__ == "__main__":
    # Physical-ish constants (scaled units).
    A0, Om, Q, k = 10.0, 1.0, 400.0, 40.0
    t = 0.37
    key = jax.random.PRNGKey(0)

    configs = [
        dict(hidden_nodes=[32], B=8, block_b=None),       # single hidden layer
        dict(hidden_nodes=[8, 16], B=300, block_b=128),   # MXU path + grid>1
        dict(hidden_nodes=[8, 16], B=300, block_b=None),  # adaptive single tile
    ]

    for cfg in configs:
        key, kx, kd, kp = jax.random.split(key, 4)
        B = cfg["B"]
        x = jax.random.normal(kx, (B, 2), dtype=jnp.float32)          # [y, z]
        d = 5.0 + 0.5 * jax.random.normal(kd, (B, 1), dtype=jnp.float32)
        params = init_params(kp, cfg["hidden_nodes"], std=0.1, random_bias=True)

        out = afm_neural_ode_forward(t, x, d, params, A0=A0, Om=Om, Q=Q, k=k,
                                     block_b=cfg["block_b"])
        out = jax.block_until_ready(out)

        ref = reference_forward(t, x, d, params, A0=A0, Om=Om, Q=Q, k=k)
        np.testing.assert_allclose(np.asarray(out), np.asarray(ref),
                                   rtol=1e-5, atol=1e-5)

    print("KERNEL_OK")
</pallas_src>

<mosaic_0001>
module attributes {stable_mosaic.version = 11 : i64} {
  func.func @kernel(%arg0: i32, %arg1: memref<2x128xf32, #tpu.memory_space<vmem>>, %arg2: memref<1x128xf32, #tpu.memory_space<vmem>>, %arg3: memref<32x4xf32, #tpu.memory_space<vmem>>, %arg4: memref<1xf32, #tpu.memory_space<smem>>, %arg5: memref<2x128xf32, #tpu.memory_space<vmem>>) attributes {dimension_semantics = [#tpu.dimension_semantics<parallel>], iteration_bounds = array<i64: 1>, scalar_prefetch = 0 : i64, scratch_operands = 0 : i64, tpu.core_type = #tpu.core_type<tc>, window_params = [{transform_indices = @transform_0, window_bounds = array<i64: 2, 128>}, {transform_indices = @transform_1, window_bounds = array<i64: 1, 128>}, {pipeline_mode = #tpu.pipeline_mode<synchronous>, transform_indices = @transform_2, window_bounds = array<i64: 32, 4>}, {transform_indices = @transform_3, window_bounds = array<i64: 1>}, {transform_indices = @transform_4, window_bounds = array<i64: 2, 128>}]} {
    %c0 = arith.constant 0 : index
    %c0_0 = arith.constant 0 : index
    %0 = vector.load %arg1[%c0, %c0_0] : memref<2x128xf32, #tpu.memory_space<vmem>>, vector<1x128xf32>
    %c1 = arith.constant 1 : index
    %c0_1 = arith.constant 0 : index
    %1 = vector.load %arg1[%c1, %c0_1] : memref<2x128xf32, #tpu.memory_space<vmem>>, vector<1x128xf32>
    %c0_2 = arith.constant 0 : index
    %c0_3 = arith.constant 0 : index
    %2 = vector.load %arg3[%c0_2, %c0_3] : memref<32x4xf32, #tpu.memory_space<vmem>>, vector<32x1xf32>
    %c0_4 = arith.constant 0 : index
    %c1_5 = arith.constant 1 : index
    %3 = vector.load %arg3[%c0_4, %c1_5] : memref<32x4xf32, #tpu.memory_space<vmem>>, vector<32x1xf32>
    %4 = vector.broadcast %2 : vector<32x1xf32> to vector<32x128xf32>
    %5 = vector.broadcast %1 : vector<1x128xf32> to vector<32x128xf32>
    %6 = arith.mulf %4, %5 : vector<32x128xf32>
    %7 = vector.broadcast %3 : vector<32x1xf32> to vector<32x128xf32>
    %8 = arith.addf %6, %7 : vector<32x128xf32>
    %c0_6 = arith.constant 0 : index
    %c2 = arith.constant 2 : index
    %9 = vector.load %arg3[%c0_6, %c2] : memref<32x4xf32, #tpu.memory_space<vmem>>, vector<32x1xf32>
    %c0_7 = arith.constant 0 : index
    %c3 = arith.constant 3 : index
    %10 = vector.load %arg3[%c0_7, %c3] : memref<32x4xf32, #tpu.memory_space<vmem>>, vector<1x1xf32>
    %11 = math.tanh %8 : vector<32x128xf32>
    %12 = vector.broadcast %9 : vector<32x1xf32> to vector<32x128xf32>
    %13 = arith.mulf %12, %11 : vector<32x128xf32>
    %cst = arith.constant dense<0.000000e+00> : vector<128xf32>
    %14 = vector.multi_reduction <add>, %13, %cst [0] : vector<32x128xf32> to vector<128xf32>
    %15 = vector.shape_cast %14 : vector<128xf32> to vector<1x128xf32>
    %16 = vector.broadcast %10 : vector<1x1xf32> to vector<1x128xf32>
    %17 = arith.addf %15, %16 : vector<1x128xf32>
    %c0_8 = arith.constant 0 : index
    %18 = memref.load %arg4[%c0_8] : memref<1xf32, #tpu.memory_space<smem>>
    %c0_9 = arith.constant 0 : index
    %c0_10 = arith.constant 0 : index
    %19 = vector.load %arg2[%c0_9, %c0_10] : memref<1x128xf32, #tpu.memory_space<vmem>>, vector<1x128xf32>
    %20 = vector.broadcast %18 : f32 to vector<1x128xf32>
    %21 = arith.addf %19, %20 : vector<1x128xf32>
    %cst_11 = arith.constant 2.500000e-02 : f32
    %22 = vector.broadcast %cst_11 : f32 to vector<1x128xf32>
    %23 = arith.mulf %17, %22 : vector<1x128xf32>
    %24 = arith.addf %21, %23 : vector<1x128xf32>
    %cst_12 = arith.constant -2.500000e-03 : f32
    %25 = vector.broadcast %cst_12 : f32 to vector<1x128xf32>
    %26 = arith.mulf %25, %0 : vector<1x128xf32>
    %27 = arith.subf %26, %1 : vector<1x128xf32>
    %28 = arith.addf %27, %24 : vector<1x128xf32>
    %c0_13 = arith.constant 0 : index
    %c0_14 = arith.constant 0 : index
    %29 = vector.load %arg5[%c0_13, %c0_14] : memref<2x128xf32, #tpu.memory_space<vmem>>, vector<1x128xf32>
    tpu.vector_store %arg5[%c0_13, %c0_14], %28 {strides = array<i32>} : memref<2x128xf32, #tpu.memory_space<vmem>>, vector<1x128xf32>,
    %c1_15 = arith.constant 1 : index
    %c0_16 = arith.constant 0 : index
    %30 = vector.load %arg5[%c1_15, %c0_16] : memref<2x128xf32, #tpu.memory_space<vmem>>, vector<1x128xf32>
    tpu.vector_store %arg5[%c1_15, %c0_16], %0 {strides = array<i32>} : memref<2x128xf32, #tpu.memory_space<vmem>>, vector<1x128xf32>,
    return
  }
  func.func @transform_0(%arg0: i32) -> (i32, i32) {
    %c0_i32 = arith.constant 0 : i32
    %c0_i32_0 = arith.constant 0 : i32
    return %c0_i32, %arg0 : i32, i32
  }
  func.func @transform_1(%arg0: i32) -> (i32, i32) {
    %c0_i32 = arith.constant 0 : i32
    %c0_i32_0 = arith.constant 0 : i32
    return %c0_i32, %arg0 : i32, i32
  }
  func.func @transform_2(%arg0: i32) -> (i32, i32) {
    %c0_i32 = arith.constant 0 : i32
    %c0_i32_0 = arith.constant 0 : i32
    %c0_i32_1 = arith.constant 0 : i32
    return %c0_i32, %c0_i32_0 : i32, i32
  }
  func.func @transform_3(%arg0: i32) -> i32 {
    %c0_i32 = arith.constant 0 : i32
    %c0_i32_0 = arith.constant 0 : i32
    return %c0_i32 : i32
  }
  func.func @transform_4(%arg0: i32) -> (i32, i32) {
    %c0_i32 = arith.constant 0 : i32
    %c0_i32_0 = arith.constant 0 : i32
    return %c0_i32, %arg0 : i32, i32
  }
}

</mosaic_0001>

<bundles_post_ra>
// kernel: tpu_custom_call.1
= control target key start
LH: loop header
LB: loop body
LE: loop exit
PB: predicated region body
PF: predicated region fallthrough
CT: control target
= control target key end

     0   :  { %v184_v2 = vmov 0   ;;  %s253_s0 = inlined_call_operand.vmem [shape: f32[2,128], index: 0, kind: input, shape index: {}]   ;;  %s254_s1 = inlined_call_operand.vmem [shape: f32[1,128], index: 1, kind: input, shape index: {}]   ;;  %s255_s2 = inlined_call_operand.vmem [shape: f32[32,4], index: 2, kind: input, shape index: {}]   ;;  %s256_s3 = inlined_call_operand.<no memory space> [shape: f32[1], index: 3, kind: input, shape index: {}]   ;;  %s257_s4 = inlined_call_operand.hbm [shape: f32[2,128], index: 4, kind: output, shape index: {}]  }
   0x1   :  { %v23_v0 = vld [vmem:[%s255_s2 + $0x10] sm:$0xff]  ;;  %v21_v1 = vld [vmem:[%s255_s2] sm:$0xff]  ;;  %144 = vset.pattern.permute.xlu1 %v184_v2  ;;  %143 = vset.pattern.permute.xlu0 %v184_v2 }
   0x2   :  { %37 = vperm.xlu1 %144, %v23_v0   ;;  %27 = vperm.xlu0 %143, %v21_v1  }
   0x3   :  { %10 = vsyncpa [#allocation4], 0  ;;  %v22_v3 = vld [vmem:[%s255_s2 + $0x8] sm:$0xff]  ;;  %v185_v4 = vmov 1   ;;  %v24_v5 = vld [vmem:[%s255_s2 + $0x18] sm:$0xff]  ;;  %v186_v6 = vmov 2   ;;  %v45_v10 = vlaneseq  ;;  %v115_v52 = vstv %s256_s3 }
   0x4   :  { %v73_v7 = vld [vmem:[%s255_s2] sm:$0x1]  ;;  %v187_v8 = vmov 3   ;;  %v20_v15 = vld [vmem:[%s253_s0 + $0x1] sm:$0x1]  ;;  %s188_s5 = smov [#allocation3]  }
   0x5   :  { %v19_v9 = vld [vmem:[%s253_s0] sm:$0x1]  ;;  %v46_v11 = vshrl.u32 %v45_v10, 7  ;;  %s130_s6 = sshll.u32 %s188_s5, 4  ;;  %s131_s6 = int_to_ptr.vmem [resolvable:$true] %s130_s6 }
   0x6   :  { %145 = vset.pattern.permute.xlu1 %v185_v4  ;;  %32 = vperm.xlu0 %143, %v22_v3   ;;  %123 = vst [vmem:[#allocation3 + $0x1] sm:$0x1] %v19_v9  ;;  %v114_v51 = vld [vmem:[%s254_s1] sm:$0x1]  ;;  %v119_v55 = vmul.f32 -0.0025, %v19_v9  ;;  %p165_p1 = scmp.lt.s32.totalorder %s131_s6, %s131_s6 }
   0x7   :  { %54 = vperm.xlu1 %145, %v21_v1   ;;  %v47_v14 = vsub.s32 0, %v46_v11  ;;  %v116_v56 = vadd.f32 %v115_v52, %v114_v51  ;;  %s160_s7 = scalar_lea.vmem %s131_s6, 32 }
   0x8   :  { %v120_v59 = vsub.f32 %v119_v55, %v20_v15  ;;  %p161_p0 = scmp.ne.s32.totalorder %s131_s6, %s160_s7  ;;  %p166_p2 = scmp.lt.s32.totalorder %s160_s7, %s160_s7 }
   0x9   :  { %v48_v18 = vrot.slane %v20_v15, %v47_v14 }
   0xa   :  { %146 = vset.pattern.permute.xlu0 %v185_v4  ;;  %p167_p3 = por %p166_p2, %p165_p1 }
   0xb   :  { %147 = vset.pattern.permute.xlu1 %v184_v2  ;;  %58 = vperm.xlu0 %146, %v22_v3  }
   0xc   :  { %42 = vperm.xlu1 %147, %v24_v5   ;;  %p168_p4 = pnand %p167_p3, %p161_p0 }
   0xf   :  { %66 = vperm.xlu0 %146, %v24_v5  }
  0x10   :  { %148 = vset.pattern.permute.xlu1 %v185_v4 }
  0x11   :  { %62 = vperm.xlu1 %148, %v23_v0  }
  0x13   :  { %150 = vset.pattern.permute.xlu0 %v186_v6 }
  0x14   :  { %83 = vperm.xlu0 %150, %v22_v3  }
  0x15   :  { %149 = vset.pattern.permute.xlu1 %v186_v6 }
  0x16   :  { %79 = vperm.xlu1 %149, %v21_v1  }
  0x18   :  { %151 = vset.pattern.permute.xlu0 %v187_v8 }
  0x19   :  { %109 = vperm.xlu0 %151, %v73_v7  }
  0x1a   :  { %87 = vperm.xlu1 %149, %v23_v0  }
  0x1e   :  { %91 = vperm.xlu1 %149, %v24_v5  }
  0x81   :  { %v38_v12 = vpop.permute.xlu1 %37  ;;  %v28_v13 = vpop.permute.xlu0 %27 }
  0x82   :  { %v49_v19 = vmul.f32 %v48_v18, %v28_v13  ;;  %v51_v27 = vmul.f32 %v48_v18, %v38_v12 }
  0x85   :  { %v33_v16 = vpop.permute.xlu0 %32 }
  0x86   :  { %v55_v17 = vpop.permute.xlu1 %54  ;;  %v50_v20 = vmul.f32 %v48_v18, %v33_v16 }
  0x87   :  { %v69_v24 = vadd.f32 %v55_v17, %v49_v19 }
  0x8a   :  { %v59_v21 = vpop.permute.xlu0 %58 }
  0x8b   :  { %v70_v22 = vadd.f32 %v59_v21, %v50_v20  ;;  %v43_v23 = vpop.permute.xlu1 %42 }
  0x8c   :  { %v52_v25 = vmul.f32 %v48_v18, %v43_v23 }
  0x8d   :  { %152 = vtanh.f32 %v70_v22 }
  0x8e   :  { %v67_v26 = vpop.permute.xlu0 %66  ;;  %154 = vtanh.f32 %v69_v24 }
  0x8f   :  { %v72_v29 = vadd.f32 %v67_v26, %v52_v25 }
  0x90   :  { %v63_v28 = vpop.permute.xlu1 %62 }
  0x91   :  { %v71_v30 = vadd.f32 %v63_v28, %v51_v27 }
  0x93   :  { %156 = vtanh.f32 %v71_v30  ;;  %v84_v33 = vpop.permute.xlu0 %83 }
  0x94   :  { %158 = vtanh.f32 %v72_v29 }
  0x95   :  { %v80_v31 = vpop.permute.xlu1 %79 }
  0x97   :  { %v153_v32 = vpop.eup %152 }
  0x98   :  { %v95_v35 = vmul.f32 %v153_v32, %v84_v33  ;;  %v155_v36 = vpop.eup %154  ;;  %v110_v53 = vpop.permute.xlu0 %109 }
  0x99   :  { %v88_v34 = vpop.permute.xlu1 %87  ;;  %v94_v37 = vmul.f32 %v155_v36, %v80_v31 }
  0x9b   :  { %v98_v40 = vadd.f32 %v95_v35, %v94_v37 }
  0x9d   :  { %v157_v38 = vpop.eup %156  ;;  %v92_v39 = vpop.permute.xlu1 %91 }
  0x9e   :  { %v96_v41 = vmul.f32 %v157_v38, %v88_v34  ;;  %v159_v42 = vpop.eup %158 }
  0x9f   :  { %v97_v44 = vmul.f32 %v159_v42, %v92_v39 }
  0xa0   :  { %v99_v43 = vadd.f32 %v98_v40, %v96_v41 }
  0xa2   :  { %v100_v45 = vadd.f32 %v99_v43, %v97_v44 }
  0xa4   :  { %v101_v46 = vrot.slane %v100_v45, 4 }
  0xa6   :  { %v102_v47 = vadd.f32 %v101_v46, %v100_v45 }
  0xa8   :  { %v103_v48 = vrot.slane %v102_v47, 2 }
  0xaa   :  { %v104_v49 = vadd.f32 %v103_v48, %v102_v47 }
  0xac   :  { %v105_v50 = vrot.slane %v104_v49, 1 }
  0xae   :  { %v106_v54 = vadd.f32 %v105_v50, %v104_v49 }
  0xb0   :  { %v112_v57 = vadd.f32 %v110_v53, %v106_v54 }
  0xb2   :  { %v117_v58 = vmul.f32 0.025, %v112_v57 }
  0xb4   :  { %v118_v60 = vadd.f32 %v117_v58, %v116_v56 }
  0xb6   :  { %v121_v61 = vadd.f32 %v120_v59, %v118_v60 }
  0xb8   :  { %122 = vst [vmem:[#allocation3] sm:$0x1] %v121_v61 }
  0xb9   :  { %171 = shalt.err (!%p168_p4)
}
  0xba   :  { %s172_s8 = scalar_lea.hbm %s257_s4, 32 }
  0xbb   :  { %p173_p5 = scmp.ne.s32.totalorder %s257_s4, %s172_s8  ;;  %p176_p6 = scmp.lt.u32.totalorder %s172_s8, %s257_s4 }
  0xbd   :  { %p178_p7 = pnand %p176_p6, %p173_p5 }
  0xbf   :  { %181 = shalt.err (!%p178_p7)
}
  0xc0   :  { %133 = dma.vmem_to_hbm [thread:$0]  %s131_s6, 32, %s257_s4, [#allocation4]  }
  0xc1   :  { %182 = dma.done.wait [#allocation4], 32  }
  0xc2   :  { %183 = vsyncadd [#allocation4], 4294967264 }
  0xc3   :  { %137 = vsyncpa [#allocation4], 1 }

</bundles_post_ra>
